<compile_context>
chip_gen: v7x
topology: tpu7x:2x2x1
jax: 0.10.0
libtpu: 0.0.40
codegen_flags: <defaults>
</compile_context>

<pallas_src>
import functools

import jax
import jax.numpy as jnp
from jax import lax
from jax.experimental import pallas as pl
from jax.experimental.pallas import tpu as pltpu


def _ce_w_kernel(logits_ref, target_ref, wt_ref, out_ref):
    x = logits_ref[...].astype(jnp.float32)           # (T, C) f32 compute
    tgt = target_ref[...]                              # (T, 1) int32
    w_t = wt_ref[...]                                  # (T, 1) f32 (pre-gathered weight)
    t, c = x.shape

    # Numerically stable logsumexp over the class (lane) axis.
    m = jnp.max(x, axis=-1, keepdims=True)                                  # (T, 1)
    lse = m + jnp.log(jnp.sum(jnp.exp(x - m), axis=-1, keepdims=True))      # (T, 1)

    # Pick x[i, target[i]] with a single compare + select + lane reduce.
    col = lax.broadcasted_iota(jnp.int32, (t, c), 1)                        # (T, C)
    picked_x = jnp.sum(jnp.where(col == tgt, x, 0.0), axis=-1, keepdims=True)  # (T, 1)

    # -w * logp[i, tgt] = -w * (picked_x - lse) = w * (lse - picked_x)
    out_ref[...] = w_t * (lse - picked_x)              # (T, 1)


@functools.partial(jax.jit, static_argnames=("tile_n",))
def cross_entropy_loss_w(logits, target, class_weights, *, tile_n=256):
    """Per-sample weighted cross-entropy. logits [N, C] (any float dtype),
    target [N] int, class_weights [C] float. Returns [N] float32."""
    n, c = logits.shape
    tgt = target.astype(jnp.int32)

    # Gather the per-sample class weight in the wrapper (tiny XLA gather);
    # the kernel then needs only one full-width masked reduction.
    w_t = class_weights.astype(jnp.float32)[tgt].reshape(n, 1)
    tgt2d = tgt.reshape(n, 1)

    # Pick the batch tile. If everything fits in one tile, use the full N
    # (block == full array dim, so no (8,128) divisibility constraint).
    if n <= tile_n:
        tile = n
        n_pad = n
    else:
        tile = tile_n                                   # multiple of 8
        n_pad = ((n + tile - 1) // tile) * tile

    if n_pad != n:
        pad = n_pad - n
        logits = jnp.pad(logits, ((0, pad), (0, 0)))
        tgt2d = jnp.pad(tgt2d, ((0, pad), (0, 0)))
        w_t = jnp.pad(w_t, ((0, pad), (0, 0)))          # padded rows -> loss 0, sliced off

    grid = (n_pad // tile,)
    out = pl.pallas_call(
        _ce_w_kernel,
        out_shape=jax.ShapeDtypeStruct((n_pad, 1), jnp.float32),
        grid=grid,
        in_specs=[
            pl.BlockSpec((tile, c), lambda i: (i, 0)),  # logits tile (native dtype)
            pl.BlockSpec((tile, 1), lambda i: (i, 0)),  # targets
            pl.BlockSpec((tile, 1), lambda i: (i, 0)),  # pre-gathered weights
        ],
        out_specs=pl.BlockSpec((tile, 1), lambda i: (i, 0)),
        compiler_params=pltpu.CompilerParams(
            dimension_semantics=("parallel",),          # v7x: shard tiles over both TCs
        ),
    )(logits, tgt2d, w_t)

    return out[:n, 0]

    # TODO(synk): for vocab-scale C (>=32K) add a second ("arbitrary") grid axis over C
    # with an online-softmax accumulator (running max / sum / picked) finalized via pl.when.


def _reference(logits, target, class_weights):
    logp = jax.nn.log_softmax(logits.astype(jnp.float32), axis=-1)
    picked = jnp.take_along_axis(logp, target[:, None].astype(jnp.int32), axis=-1)[:, 0]
    w = class_weights.astype(jnp.float32)[target]
    return -w * picked


if __name__ == "__main__":
    key = jax.random.PRNGKey(0)

    # Case 1: small single-tile problem (matches module's typical small-batch use).
    k1, k2, k3 = jax.random.split(key, 3)
    N1, C1 = 8, 32
    logits1 = jax.random.normal(k1, (N1, C1), dtype=jnp.float32)
    target1 = jax.random.randint(k2, (N1,), 0, C1, dtype=jnp.int32)
    weights1 = jax.random.uniform(k3, (C1,), dtype=jnp.float32, minval=0.5, maxval=2.0)

    out1 = jax.block_until_ready(cross_entropy_loss_w(logits1, target1, weights1))
    ref1 = _reference(logits1, target1, weights1)
    assert out1.shape == (N1,)
    assert jnp.allclose(out1, ref1, atol=1e-5, rtol=1e-5), (out1, ref1)

    # Case 2: exercises the batch grid (multiple tiles + padding path).
    k4, k5, k6 = jax.random.split(jax.random.PRNGKey(1), 3)
    N2, C2 = 300, 256
    logits2 = jax.random.normal(k4, (N2, C2), dtype=jnp.float32)
    target2 = jax.random.randint(k5, (N2,), 0, C2, dtype=jnp.int32)
    weights2 = jax.random.uniform(k6, (C2,), dtype=jnp.float32, minval=0.5, maxval=2.0)

    out2 = jax.block_until_ready(cross_entropy_loss_w(logits2, target2, weights2, tile_n=128))
    ref2 = _reference(logits2, target2, weights2)
    assert out2.shape == (N2,)
    assert jnp.allclose(out2, ref2, atol=1e-5, rtol=1e-5), (out2, ref2)

    print("KERNEL_OK")
</pallas_src>

<mosaic_0001>
module attributes {stable_mosaic.version = 11 : i64} {
  func.func @_ce_w_kernel(%arg0: i32, %arg1: memref<8x32xf32, #tpu.memory_space<vmem>>, %arg2: memref<8x1xi32, #tpu.memory_space<vmem>>, %arg3: memref<8x1xf32, #tpu.memory_space<vmem>>, %arg4: memref<8x1xf32, #tpu.memory_space<vmem>>) attributes {dimension_semantics = [#tpu.dimension_semantics<parallel>], iteration_bounds = array<i64: 1>, scalar_prefetch = 0 : i64, scratch_operands = 0 : i64, tpu.core_type = #tpu.core_type<tc>, window_params = [{transform_indices = @transform_0, window_bounds = array<i64: 8, 32>}, {transform_indices = @transform_1, window_bounds = array<i64: 8, 1>}, {transform_indices = @transform_2, window_bounds = array<i64: 8, 1>}, {transform_indices = @transform_3, window_bounds = array<i64: 8, 1>}]} {
    %c0 = arith.constant 0 : index
    %c0_0 = arith.constant 0 : index
    %0 = vector.load %arg1[%c0, %c0_0] : memref<8x32xf32, #tpu.memory_space<vmem>>, vector<8x32xf32>
    %c0_1 = arith.constant 0 : index
    %c0_2 = arith.constant 0 : index
    %1 = vector.load %arg2[%c0_1, %c0_2] : memref<8x1xi32, #tpu.memory_space<vmem>>, vector<8x1xi32>
    %c0_3 = arith.constant 0 : index
    %c0_4 = arith.constant 0 : index
    %2 = vector.load %arg3[%c0_3, %c0_4] : memref<8x1xf32, #tpu.memory_space<vmem>>, vector<8x1xf32>
    %cst = arith.constant dense<0xFF800000> : vector<8xf32>
    %3 = vector.multi_reduction <maximumf>, %0, %cst [1] : vector<8x32xf32> to vector<8xf32>
    %4 = vector.shape_cast %3 : vector<8xf32> to vector<8x1xf32>
    %5 = vector.broadcast %4 : vector<8x1xf32> to vector<8x32xf32>
    %6 = arith.subf %0, %5 : vector<8x32xf32>
    %7 = math.exp %6 : vector<8x32xf32>
    %cst_5 = arith.constant dense<0.000000e+00> : vector<8xf32>
    %8 = vector.multi_reduction <add>, %7, %cst_5 [1] : vector<8x32xf32> to vector<8xf32>
    %9 = vector.shape_cast %8 : vector<8xf32> to vector<8x1xf32>
    %10 = math.log %9 : vector<8x1xf32>
    %11 = arith.addf %4, %10 : vector<8x1xf32>
    %12 = tpu.iota {dimensions = array<i32: 1>} : vector<8x32xi32>
    %13 = vector.broadcast %1 : vector<8x1xi32> to vector<8x32xi32>
    %14 = arith.cmpi eq, %12, %13 : vector<8x32xi32>
    %cst_6 = arith.constant 0.000000e+00 : f32
    %15 = vector.broadcast %cst_6 : f32 to vector<8x32xf32>
    %16 = arith.select %14, %0, %15 : vector<8x32xi1>, vector<8x32xf32>
    %cst_7 = arith.constant dense<0.000000e+00> : vector<8xf32>
    %17 = vector.multi_reduction <add>, %16, %cst_7 [1] : vector<8x32xf32> to vector<8xf32>
    %18 = vector.shape_cast %17 : vector<8xf32> to vector<8x1xf32>
    %19 = arith.subf %11, %18 : vector<8x1xf32>
    %20 = arith.mulf %2, %19 : vector<8x1xf32>
    %c0_8 = arith.constant 0 : index
    %c0_9 = arith.constant 0 : index
    %21 = vector.load %arg4[%c0_8, %c0_9] : memref<8x1xf32, #tpu.memory_space<vmem>>, vector<8x1xf32>
    tpu.vector_store %arg4[%c0_8, %c0_9], %20 {strides = array<i32>} : memref<8x1xf32, #tpu.memory_space<vmem>>, vector<8x1xf32>,
    return
  }
  func.func @transform_0(%arg0: i32) -> (i32, i32) {
    %c0_i32 = arith.constant 0 : i32
    %c0_i32_0 = arith.constant 0 : i32
    return %arg0, %c0_i32 : i32, i32
  }
  func.func @transform_1(%arg0: i32) -> (i32, i32) {
    %c0_i32 = arith.constant 0 : i32
    %c0_i32_0 = arith.constant 0 : i32
    return %arg0, %c0_i32 : i32, i32
  }
  func.func @transform_2(%arg0: i32) -> (i32, i32) {
    %c0_i32 = arith.constant 0 : i32
    %c0_i32_0 = arith.constant 0 : i32
    return %arg0, %c0_i32 : i32, i32
  }
  func.func @transform_3(%arg0: i32) -> (i32, i32) {
    %c0_i32 = arith.constant 0 : i32
    %c0_i32_0 = arith.constant 0 : i32
    return %arg0, %c0_i32 : i32, i32
  }
}

</mosaic_0001>

<bundles_post_ra>
// kernel: cross_entropy_loss_w.1
= control target key start
LH: loop header
LB: loop body
LE: loop exit
PB: predicated region body
PF: predicated region fallthrough
CT: control target
= control target key end

     0   :  { %vm17_vm0 = vcmask 261120   ;;  %v54_v1 = vmov 0   ;;  %v30_v7 = vlaneseq  ;;  %vm42_vm2 = vcmask 7168   ;;  %s90_s0 = inlined_call_operand.vmem [shape: f32[8,32], index: 0, kind: input, shape index: {}]   ;;  %s91_s1 = inlined_call_operand.vmem [shape: s32[8,1], index: 1, kind: input, shape index: {}]   ;;  %s92_s2 = inlined_call_operand.vmem [shape: f32[8,1], index: 2, kind: input, shape index: {}]   ;;  %s93_s3 = inlined_call_operand.vmem [shape: f32[8,1], index: 3, kind: output, shape index: {}]  }
   0x1   :  { %v14_v0 = vld [vmem:[%s90_s0] sm:$0xff]  ;;  %49 = vset.pattern.permute.xlu0 %v54_v1 }
   0x2   :  { %v18_v2 = vsel %vm17_vm0, %v14_v0, -inf  ;;  %v15_v3 = vld [vmem:[%s91_s1] sm:$0xff]  ;;  %v31_v8 = vand.u32 127, %v30_v7 }
   0x3   :  { %19 = vmax.xlane.f32.xlu0 %v18_v2  ;;  %v16_v19 = vld [vmem:[%s92_s2] sm:$0xff] }
  0x19   :  { %33 = vperm.xlu0 %49, %v15_v3  }
  0x90   :  { %v20_v4 = vpop.xlane.xlu0 %19 }
  0x91   :  { %v21_v5 = vsub.f32 %v14_v0, %v20_v4 }
  0x93   :  { %v22_v6 = vmul.f32 1.442695, %v21_v5 }
  0x95   :  { %50 = vpow2.f32 %v22_v6 }
  0x98   :  { %v34_v9 = vpop.permute.xlu0 %33 }
  0x99   :  { %vm35_vm1 = vcmp.eq.s32.totalorder %v31_v8, %v34_v9 }
  0x9a   :  { %v36_v11 = vsel %vm35_vm1, %v14_v0, 0.0 }
  0x9b   :  { %v37_v13 = vsel %vm17_vm0, %v36_v11, 0.0 }
  0x9f   :  { %v51_v10 = vpop.eup %50 }
  0xa0   :  { %v24_v12 = vsel %vm17_vm0, %v51_v10, 0.0 }
  0xa1   :  { %25 = vadd.xlane.f32.xlu1 %v24_v12 }
  0xa5   :  { %38 = vadd.xlane.f32.xlu1 %v37_v13 }
 0x12e   :  { %v26_v14 = vpop.xlane.xlu1 %25 }
 0x12f   :  { %52 = vlog2.f32 %v26_v14 }
 0x132   :  { %v39_v17 = vpop.xlane.xlu1 %38 }
 0x139   :  { %v53_v15 = vpop.eup %52 }
 0x13a   :  { %v28_v16 = vmul.f32 0.6931472, %v53_v15 }
 0x13c   :  { %v29_v18 = vadd.f32 %v28_v16, %v20_v4 }
 0x13e   :  { %v40_v20 = vsub.f32 %v29_v18, %v39_v17 }
 0x140   :  { %v41_v21 = vmul.f32 %v40_v20, %v16_v19 }
 0x142   :  { %43 = vst.msk [vmem:[%s93_s3] sm:$0xff] %vm42_vm2, %v41_v21 }

</bundles_post_ra>
